<compile_context>
chip_gen: v5e
topology: v5e:2x2
jax: 0.10.0
libtpu: 0.0.40
codegen_flags: <defaults>
</compile_context>

<pallas_src>
import functools
import math

import jax
import jax.numpy as jnp
from jax.experimental import pallas as pl
from jax.experimental.pallas import tpu as pltpu

DIM = 2            # domain.dim
N_HIDDEN = 32
N_LAYERS = 2       # number of (Linear, Tanh) blocks in hid_layers
TM = 8192          # default points per grid step (lane tile), multiple of 256
LANE_ALIGN = 256   # keep lane extent 256-aligned (v6e/v7x MXU columns)

STAR_AMP = 0.3     # amplitude of the star-shaped boundary perturbation
EPS = 1e-12


def _round_up(x, m):
    return ((x + m - 1) // m) * m


def _deeponet_kernel(x_ref, w_in_ref, b_in_ref, w_hid_ref, b_hid_ref,
                     w_eff_ref, b_eff_ref, o_ref, *, n_layers):
    # Feature-major layout: x_ref is (DIM, TM); every per-point quantity is a
    # lane-dense (1, TM) or (H, TM) slab.
    x = x_ref[...]                                   # (DIM, TM) f32
    px = x[0:1, :]                                   # (1, TM)
    py = x[1:2, :]                                   # (1, TM)

    # ---- MLP: in_layer -> (Linear+Tanh)*n_layers -> folded output projection ----
    w_in = w_in_ref[...]                             # (H, DIM) f32
    # K=2 contraction as a rank-2 VPU update (two outer products), f32.
    h = w_in[:, 0:1] * px + w_in[:, 1:2] * py + b_in_ref[...]     # (H, TM) f32

    # Hidden (Linear + Tanh) blocks: bf16-streamed MXU dots, f32 accumulate/tanh.
    for l in range(n_layers):
        h = jnp.tanh(
            jnp.dot(w_hid_ref[l], h.astype(jnp.bfloat16),
                    preferred_element_type=jnp.float32)
            + b_hid_ref[l])                          # (H, TM) f32

    # Folded (trailing Linear(H,H) ∘ out Linear(H,1)) projection on the VPU/XLU:
    # elementwise multiply by the (H,1) effective weight column, sublane-sum.
    nn_out = jnp.sum(w_eff_ref[...] * h, axis=0, keepdims=True) + b_eff_ref[0]
    # (1, TM) f32

    # ---- spherical coordinates of the input points (lane-dense) ----
    # NOTE: kept as (1, TM) slabs; VPU has slack after the MXU cuts above.
    r = jnp.sqrt(px * px + py * py)                  # radius
    r_safe = jnp.maximum(r, EPS)
    ct = px / r_safe                                 # cos(theta), exact division
    st = py / r_safe                                 # sin(theta)

    # star-shaped domain radius R(theta) = 1 + 0.3 * cos(3 theta)
    R = 1.0 + STAR_AMP * (4.0 * ct * ct * ct - 3.0 * ct)
    ratio = r / R                                    # exact division (R is O(1))

    # linearRadial(s) = 1 - s  (zeroOnBoundaryExtension)
    decay = 1.0 - ratio

    # boundary point at the same angle, and Dirichlet data there
    bx = R * ct
    by = R * st
    g = bx * by + 0.5 * (bx * bx - by * by)          # boundaryConditionSpherical

    # forward: NN * zeroOnBoundaryExtension + DCBoundaryExtension
    o_ref[...] = nn_out * decay + g * ratio


def imposed_star_deeponet(x, params, *, n_layers=N_LAYERS, tm=TM):
    """x: (N, DIM) f32 (points-major, like the PyTorch module). Returns (N, 1) f32."""
    n = x.shape[0]
    w_in, b_in, w_hid, b_hid, w_out, b_out = params
    hdim = w_in.shape[0]

    # ---- host-side algebraic fold of the trailing linear + out layer ----
    # nn_out = w_out @ (w_hid[n_layers] @ h + b_hid[n_layers]) + b_out
    #        = (w_out @ w_hid[n_layers]) @ h + (w_out @ b_hid[n_layers] + b_out)
    w_eff = (w_out @ w_hid[n_layers]).T.astype(jnp.float32)          # (H, 1)
    b_eff = ((w_out @ b_hid[n_layers]).reshape(1) + b_out).astype(jnp.float32)
    w_hid_bf = w_hid[:n_layers].astype(jnp.bfloat16)                 # (L, H, H) bf16
    b_hid_f = b_hid[:n_layers].astype(jnp.float32)                   # (L, H, 1) f32

    # Lane tile: as large as requested, 256-aligned, and capped at ~n/2 so the
    # parallel grid has >= 2 steps (shards across both v7x TensorCores).
    half = _round_up(-(-n // 2), LANE_ALIGN)
    tm_eff = max(LANE_ALIGN, min(_round_up(tm, LANE_ALIGN), half))
    n_pad = _round_up(n, tm_eff)
    grid = n_pad // tm_eff

    # Feature-major input slab; zero padding is harmless (decay=1, g=0 there,
    # and the padded lanes are sliced away below).
    xt = jnp.pad(x.T.astype(jnp.float32), ((0, 0), (0, n_pad - n)))

    kernel = functools.partial(_deeponet_kernel, n_layers=n_layers)

    grid_spec = pltpu.PrefetchScalarGridSpec(
        num_scalar_prefetch=0,
        grid=(grid,),
        in_specs=[
            pl.BlockSpec((DIM, tm_eff), lambda i: (0, i)),           # points (DIM, TM)
            pl.BlockSpec((hdim, DIM), lambda i: (0, 0)),             # W_in  (H, DIM)
            pl.BlockSpec((hdim, 1), lambda i: (0, 0)),               # b_in  (H, 1)
            pl.BlockSpec((n_layers, hdim, hdim), lambda i: (0, 0, 0)),  # W_hid bf16
            pl.BlockSpec((n_layers, hdim, 1), lambda i: (0, 0, 0)),     # b_hid f32
            pl.BlockSpec((hdim, 1), lambda i: (0, 0)),               # w_eff (H, 1)
            pl.BlockSpec(memory_space=pltpu.MemorySpace.SMEM),       # b_eff scalar
        ],
        out_specs=pl.BlockSpec((1, tm_eff), lambda i: (0, i)),       # lane-dense out
    )
    out = pl.pallas_call(
        kernel,
        out_shape=jax.ShapeDtypeStruct((1, n_pad), jnp.float32),
        grid_spec=grid_spec,
        compiler_params=pltpu.CompilerParams(
            dimension_semantics=("parallel",)),
    )(xt, w_in.astype(jnp.float32), b_in.astype(jnp.float32),
      w_hid_bf, b_hid_f, w_eff, b_eff)
    return out[0, :n].reshape(n, 1)


def init_params(key, dim=DIM, n_hidden=N_HIDDEN, n_layers=N_LAYERS):
    """Deterministic synthetic parameters, PyTorch layout (out_features, in_features)."""
    ks = jax.random.split(key, 6)
    L = n_layers + 1

    def lin(k, fan_in, shape):
        bound = 1.0 / math.sqrt(float(fan_in))
        return jax.random.uniform(k, shape, jnp.float32, -bound, bound)

    w_in = lin(ks[0], dim, (n_hidden, dim))
    b_in = lin(ks[1], dim, (n_hidden, 1))
    w_hid = lin(ks[2], n_hidden, (L, n_hidden, n_hidden))
    b_hid = lin(ks[3], n_hidden, (L, n_hidden, 1))
    w_out = lin(ks[4], n_hidden, (1, n_hidden))
    b_out = lin(ks[5], n_hidden, (1,))
    return (w_in, b_in, w_hid, b_hid, w_out, b_out)


def reference_forward(x, params, n_layers=N_LAYERS):
    """Pure-JAX f32 reference mirroring the PyTorch forward semantics exactly."""
    w_in, b_in, w_hid, b_hid, w_out, b_out = params
    h = x @ w_in.T + b_in[:, 0]
    for l in range(n_layers):
        h = jnp.tanh(h @ w_hid[l].T + b_hid[l, :, 0])
    h = h @ w_hid[n_layers].T + b_hid[n_layers, :, 0]
    nn_out = h @ w_out.T + b_out[0]                  # (N, 1)

    px, py = x[:, 0:1], x[:, 1:2]
    r = jnp.sqrt(px * px + py * py)
    r_safe = jnp.maximum(r, EPS)
    ct, st = px / r_safe, py / r_safe
    R = 1.0 + STAR_AMP * (4.0 * ct ** 3 - 3.0 * ct)
    ratio = r / R
    decay = 1.0 - ratio
    bx, by = R * ct, R * st
    g = bx * by + 0.5 * (bx * bx - by * by)
    return nn_out * decay + g * ratio


if __name__ == "__main__":
    key = jax.random.PRNGKey(0)
    k_x, k_p = jax.random.split(key)

    N = 1000
    x = jax.random.uniform(k_x, (N, DIM), jnp.float32, -0.5, 0.5)
    params = init_params(k_p)

    # With the grid>=2 cap, a 1000-point cloud uses tm_eff=512 -> a 2-step
    # parallel grid that also exercises zero-padding of the last tile.
    out = imposed_star_deeponet(x, params)
    out = jax.block_until_ready(out)

    ref = reference_forward(x, params)
    assert out.shape == (N, 1)
    err = float(jnp.max(jnp.abs(out - ref)))
    # bf16-streamed hidden dots (f32 accumulate) give ~1e-3-level agreement vs
    # the all-f32 reference; geometry is exact-division and matches tightly.
    assert err < 1e-2, f"mismatch vs JAX reference: {err}"
    print("KERNEL_OK")
</pallas_src>

<mosaic_0001>
module attributes {stable_mosaic.version = 11 : i64} {
  func.func @_deeponet_kernel(%arg0: i32, %arg1: memref<2x512xf32, #tpu.memory_space<vmem>>, %arg2: memref<32x2xf32, #tpu.memory_space<vmem>>, %arg3: memref<32x1xf32, #tpu.memory_space<vmem>>, %arg4: memref<2x32x32xbf16, #tpu.memory_space<vmem>>, %arg5: memref<2x32x1xf32, #tpu.memory_space<vmem>>, %arg6: memref<32x1xf32, #tpu.memory_space<vmem>>, %arg7: memref<1xf32, #tpu.memory_space<smem>>, %arg8: memref<1x512xf32, #tpu.memory_space<vmem>>) attributes {dimension_semantics = [#tpu.dimension_semantics<parallel>], iteration_bounds = array<i64: 2>, scalar_prefetch = 0 : i64, scratch_operands = 0 : i64, tpu.core_type = #tpu.core_type<tc>, window_params = [{transform_indices = @transform_0, window_bounds = array<i64: 2, 512>}, {pipeline_mode = #tpu.pipeline_mode<synchronous>, transform_indices = @transform_1, window_bounds = array<i64: 32, 2>}, {pipeline_mode = #tpu.pipeline_mode<synchronous>, transform_indices = @transform_2, window_bounds = array<i64: 32, 1>}, {pipeline_mode = #tpu.pipeline_mode<synchronous>, transform_indices = @transform_3, window_bounds = array<i64: 2, 32, 32>}, {pipeline_mode = #tpu.pipeline_mode<synchronous>, transform_indices = @transform_4, window_bounds = array<i64: 2, 32, 1>}, {pipeline_mode = #tpu.pipeline_mode<synchronous>, transform_indices = @transform_5, window_bounds = array<i64: 32, 1>}, {transform_indices = @transform_6, window_bounds = array<i64: 1>}, {transform_indices = @transform_7, window_bounds = array<i64: 1, 512>}]} {
    %c0 = arith.constant 0 : index
    %c0_0 = arith.constant 0 : index
    %0 = vector.load %arg1[%c0, %c0_0] : memref<2x512xf32, #tpu.memory_space<vmem>>, vector<2x512xf32>
    %1 = vector.extract_strided_slice %0 {offsets = [0, 0], sizes = [1, 512], strides = [1, 1]} : vector<2x512xf32> to vector<1x512xf32>
    %2 = vector.extract_strided_slice %0 {offsets = [1, 0], sizes = [1, 512], strides = [1, 1]} : vector<2x512xf32> to vector<1x512xf32>
    %c0_1 = arith.constant 0 : index
    %c0_2 = arith.constant 0 : index
    %3 = vector.load %arg2[%c0_1, %c0_2] : memref<32x2xf32, #tpu.memory_space<vmem>>, vector<32x2xf32>
    %4 = vector.extract_strided_slice %3 {offsets = [0, 0], sizes = [32, 1], strides = [1, 1]} : vector<32x2xf32> to vector<32x1xf32>
    %5 = vector.broadcast %4 : vector<32x1xf32> to vector<32x512xf32>
    %6 = vector.broadcast %1 : vector<1x512xf32> to vector<32x512xf32>
    %7 = arith.mulf %5, %6 : vector<32x512xf32>
    %8 = vector.extract_strided_slice %3 {offsets = [0, 1], sizes = [32, 1], strides = [1, 1]} : vector<32x2xf32> to vector<32x1xf32>
    %9 = vector.broadcast %8 : vector<32x1xf32> to vector<32x512xf32>
    %10 = vector.broadcast %2 : vector<1x512xf32> to vector<32x512xf32>
    %11 = arith.mulf %9, %10 : vector<32x512xf32>
    %12 = arith.addf %7, %11 : vector<32x512xf32>
    %c0_3 = arith.constant 0 : index
    %c0_4 = arith.constant 0 : index
    %13 = vector.load %arg3[%c0_3, %c0_4] : memref<32x1xf32, #tpu.memory_space<vmem>>, vector<32x1xf32>
    %14 = vector.broadcast %13 : vector<32x1xf32> to vector<32x512xf32>
    %15 = arith.addf %12, %14 : vector<32x512xf32>
    %c0_5 = arith.constant 0 : index
    %c0_6 = arith.constant 0 : index
    %c0_7 = arith.constant 0 : index
    %16 = vector.load %arg4[%c0_5, %c0_6, %c0_7] : memref<2x32x32xbf16, #tpu.memory_space<vmem>>, vector<1x32x32xbf16>
    %17 = vector.shape_cast %16 : vector<1x32x32xbf16> to vector<32x32xbf16>
    %18 = arith.truncf %15 : vector<32x512xf32> to vector<32x512xbf16>
    %cst = arith.constant dense<0.000000e+00> : vector<32x512xf32>
    %19 = tpu.matmul %17, %18, %cst {dimension_numbers = #tpu.dot_dimension_numbers<[1], [0], [0], [1], [0, 0, 1, 1], [], []>} : vector<32x32xbf16>, vector<32x512xbf16>, vector<32x512xf32> -> vector<32x512xf32>
    %c0_8 = arith.constant 0 : index
    %c0_9 = arith.constant 0 : index
    %c0_10 = arith.constant 0 : index
    %20 = vector.load %arg5[%c0_8, %c0_9, %c0_10] : memref<2x32x1xf32, #tpu.memory_space<vmem>>, vector<1x32x1xf32>
    %21 = vector.shape_cast %20 : vector<1x32x1xf32> to vector<32x1xf32>
    %22 = vector.broadcast %21 : vector<32x1xf32> to vector<32x512xf32>
    %23 = arith.addf %19, %22 : vector<32x512xf32>
    %24 = math.tanh %23 : vector<32x512xf32>
    %c1 = arith.constant 1 : index
    %c0_11 = arith.constant 0 : index
    %c0_12 = arith.constant 0 : index
    %25 = vector.load %arg4[%c1, %c0_11, %c0_12] : memref<2x32x32xbf16, #tpu.memory_space<vmem>>, vector<1x32x32xbf16>
    %26 = vector.shape_cast %25 : vector<1x32x32xbf16> to vector<32x32xbf16>
    %27 = arith.truncf %24 : vector<32x512xf32> to vector<32x512xbf16>
    %cst_13 = arith.constant dense<0.000000e+00> : vector<32x512xf32>
    %28 = tpu.matmul %26, %27, %cst_13 {dimension_numbers = #tpu.dot_dimension_numbers<[1], [0], [0], [1], [0, 0, 1, 1], [], []>} : vector<32x32xbf16>, vector<32x512xbf16>, vector<32x512xf32> -> vector<32x512xf32>
    %c1_14 = arith.constant 1 : index
    %c0_15 = arith.constant 0 : index
    %c0_16 = arith.constant 0 : index
    %29 = vector.load %arg5[%c1_14, %c0_15, %c0_16] : memref<2x32x1xf32, #tpu.memory_space<vmem>>, vector<1x32x1xf32>
    %30 = vector.shape_cast %29 : vector<1x32x1xf32> to vector<32x1xf32>
    %31 = vector.broadcast %30 : vector<32x1xf32> to vector<32x512xf32>
    %32 = arith.addf %28, %31 : vector<32x512xf32>
    %33 = math.tanh %32 : vector<32x512xf32>
    %c0_17 = arith.constant 0 : index
    %c0_18 = arith.constant 0 : index
    %34 = vector.load %arg6[%c0_17, %c0_18] : memref<32x1xf32, #tpu.memory_space<vmem>>, vector<32x1xf32>
    %35 = vector.broadcast %34 : vector<32x1xf32> to vector<32x512xf32>
    %36 = arith.mulf %35, %33 : vector<32x512xf32>
    %cst_19 = arith.constant dense<0.000000e+00> : vector<512xf32>
    %37 = vector.multi_reduction <add>, %36, %cst_19 [0] : vector<32x512xf32> to vector<512xf32>
    %38 = vector.shape_cast %37 : vector<512xf32> to vector<1x512xf32>
    %c0_20 = arith.constant 0 : index
    %39 = memref.load %arg7[%c0_20] : memref<1xf32, #tpu.memory_space<smem>>
    %40 = vector.broadcast %39 : f32 to vector<1x512xf32>
    %41 = arith.addf %38, %40 : vector<1x512xf32>
    %42 = arith.mulf %1, %1 : vector<1x512xf32>
    %43 = arith.mulf %2, %2 : vector<1x512xf32>
    %44 = arith.addf %42, %43 : vector<1x512xf32>
    %45 = math.sqrt %44 : vector<1x512xf32>
    %cst_21 = arith.constant 9.99999996E-13 : f32
    %46 = vector.broadcast %cst_21 : f32 to vector<1x512xf32>
    %47 = arith.maximumf %45, %46 : vector<1x512xf32>
    %48 = arith.divf %1, %47 : vector<1x512xf32>
    %49 = arith.divf %2, %47 : vector<1x512xf32>
    %cst_22 = arith.constant 4.000000e+00 : f32
    %50 = vector.broadcast %cst_22 : f32 to vector<1x512xf32>
    %51 = arith.mulf %50, %48 : vector<1x512xf32>
    %52 = arith.mulf %51, %48 : vector<1x512xf32>
    %53 = arith.mulf %52, %48 : vector<1x512xf32>
    %cst_23 = arith.constant 3.000000e+00 : f32
    %54 = vector.broadcast %cst_23 : f32 to vector<1x512xf32>
    %55 = arith.mulf %54, %48 : vector<1x512xf32>
    %56 = arith.subf %53, %55 : vector<1x512xf32>
    %cst_24 = arith.constant 3.000000e-01 : f32
    %57 = vector.broadcast %cst_24 : f32 to vector<1x512xf32>
    %58 = arith.mulf %57, %56 : vector<1x512xf32>
    %cst_25 = arith.constant 1.000000e+00 : f32
    %59 = vector.broadcast %cst_25 : f32 to vector<1x512xf32>
    %60 = arith.addf %59, %58 : vector<1x512xf32>
    %61 = arith.divf %45, %60 : vector<1x512xf32>
    %cst_26 = arith.constant 1.000000e+00 : f32
    %62 = vector.broadcast %cst_26 : f32 to vector<1x512xf32>
    %63 = arith.subf %62, %61 : vector<1x512xf32>
    %64 = arith.mulf %60, %48 : vector<1x512xf32>
    %65 = arith.mulf %60, %49 : vector<1x512xf32>
    %66 = arith.mulf %64, %65 : vector<1x512xf32>
    %67 = arith.mulf %64, %64 : vector<1x512xf32>
    %68 = arith.mulf %65, %65 : vector<1x512xf32>
    %69 = arith.subf %67, %68 : vector<1x512xf32>
    %cst_27 = arith.constant 5.000000e-01 : f32
    %70 = vector.broadcast %cst_27 : f32 to vector<1x512xf32>
    %71 = arith.mulf %70, %69 : vector<1x512xf32>
    %72 = arith.addf %66, %71 : vector<1x512xf32>
    %73 = arith.mulf %41, %63 : vector<1x512xf32>
    %74 = arith.mulf %72, %61 : vector<1x512xf32>
    %75 = arith.addf %73, %74 : vector<1x512xf32>
    %c0_28 = arith.constant 0 : index
    %c0_29 = arith.constant 0 : index
    %76 = vector.load %arg8[%c0_28, %c0_29] : memref<1x512xf32, #tpu.memory_space<vmem>>, vector<1x512xf32>
    tpu.vector_store %arg8[%c0_28, %c0_29], %75 {strides = array<i32>} : memref<1x512xf32, #tpu.memory_space<vmem>>, vector<1x512xf32>,
    return
  }
  func.func @transform_0(%arg0: i32) -> (i32, i32) {
    %c0_i32 = arith.constant 0 : i32
    %c0_i32_0 = arith.constant 0 : i32
    return %c0_i32, %arg0 : i32, i32
  }
  func.func @transform_1(%arg0: i32) -> (i32, i32) {
    %c0_i32 = arith.constant 0 : i32
    %c0_i32_0 = arith.constant 0 : i32
    %c0_i32_1 = arith.constant 0 : i32
    return %c0_i32, %c0_i32_0 : i32, i32
  }
  func.func @transform_2(%arg0: i32) -> (i32, i32) {
    %c0_i32 = arith.constant 0 : i32
    %c0_i32_0 = arith.constant 0 : i32
    %c0_i32_1 = arith.constant 0 : i32
    return %c0_i32, %c0_i32_0 : i32, i32
  }
  func.func @transform_3(%arg0: i32) -> (i32, i32, i32) {
    %c0_i32 = arith.constant 0 : i32
    %c0_i32_0 = arith.constant 0 : i32
    %c0_i32_1 = arith.constant 0 : i32
    %c0_i32_2 = arith.constant 0 : i32
    return %c0_i32, %c0_i32_0, %c0_i32_1 : i32, i32, i32
  }
  func.func @transform_4(%arg0: i32) -> (i32, i32, i32) {
    %c0_i32 = arith.constant 0 : i32
    %c0_i32_0 = arith.constant 0 : i32
    %c0_i32_1 = arith.constant 0 : i32
    %c0_i32_2 = arith.constant 0 : i32
    return %c0_i32, %c0_i32_0, %c0_i32_1 : i32, i32, i32
  }
  func.func @transform_5(%arg0: i32) -> (i32, i32) {
    %c0_i32 = arith.constant 0 : i32
    %c0_i32_0 = arith.constant 0 : i32
    %c0_i32_1 = arith.constant 0 : i32
    return %c0_i32, %c0_i32_0 : i32, i32
  }
  func.func @transform_6(%arg0: i32) -> i32 {
    %c0_i32 = arith.constant 0 : i32
    %c0_i32_0 = arith.constant 0 : i32
    return %c0_i32 : i32
  }
  func.func @transform_7(%arg0: i32) -> (i32, i32) {
    %c0_i32 = arith.constant 0 : i32
    %c0_i32_0 = arith.constant 0 : i32
    return %c0_i32, %arg0 : i32, i32
  }
}

</mosaic_0001>

<bundles_post_ra>
// kernel: tpu_custom_call.1
= control target key start
LH: loop header
LB: loop body
LE: loop exit
PB: predicated region body
PF: predicated region fallthrough
CT: control target
= control target key end

     0   :  { %s1563_s0 = inlined_call_operand.vmem [shape: f32[2,1024], index: 0, kind: input, shape index: {}]   ;;  %s1564_s1 = inlined_call_operand.vmem [shape: f32[32,2], index: 1, kind: input, shape index: {}]   ;;  %s1565_s2 = inlined_call_operand.vmem [shape: f32[32,1], index: 2, kind: input, shape index: {}]   ;;  %s1566_s3 = inlined_call_operand.vmem [shape: bf16[2,32,32], index: 3, kind: input, shape index: {}]   ;;  %s1567_s4 = inlined_call_operand.vmem [shape: f32[2,32,1], index: 4, kind: input, shape index: {}]   ;;  %s1568_s5 = inlined_call_operand.vmem [shape: f32[32,1], index: 5, kind: input, shape index: {}]   ;;  %s1569_s6 = inlined_call_operand.<no memory space> [shape: f32[1], index: 6, kind: input, shape index: {}]   ;;  %s1570_s7 = inlined_call_operand.hbm [shape: f32[1,1024], index: 7, kind: output, shape index: {}]  }
   0x1   :  { %12 = sst [smem:[#allocation2]] %s1569_s6 }
   0x2   :  { %13 = vsyncpa [#allocation4], 0 }
   0x3   :  { %15 = vsyncpa [#allocation4 + $0x1], 0  ;;  %s1301_s26 = smov 0   ;;  %s1303_s27 = smov 0  }
   0x4   :  { %s1305_s28 = smov 0   ;;  %s1307_s29 = smov 0  }
   0x5 LB: > { %s1016_s6 = sadd.s32 4294967295, %s1254_s29   ;;  %s1017_s30 = sadd.s32 4294967294, %s1254_s29   ;;  %s1254_s29 = sphi %s1307_s29, %s1580_s29   ;;  %s1250_s28 = sphi %s1305_s28, %s1579_s28   ;;  %s1246_s27 = sphi %s1303_s27, %s1578_s27   ;;  %s1242_s26 = sphi %s1301_s26, %s1577_s26  }
   0x6   : > { %s1324_s8 = sadd.s32 1, %s1254_s29   ;;  %s180_s9 = sadd.s32 1, %s1250_s28 }
   0x7   : > { %s177_s10 = ssub.s32 %s1254_s29, %s1324_s8  ;;  %p190_p0 = scmp.ne.s32.totalorder %s1250_s28, %s1246_s27 }
   0x8   : > { %p178_p1 = scmp.eq.s32.totalorder %s177_s10, 0  ;;  %p191_p2 = scmp.eq.s32.totalorder %s1016_s6, 1 }
   0x9   : > { %p196_p3 = scmp.ne.s32.totalorder %s1246_s27, %s1242_s26  ;;  %p197_p4 = scmp.eq.s32.totalorder %s1017_s30, 1 }
   0xa   : > { %s1336_s11 = scalar_select %p178_p1, %s1250_s28, %s180_s9  }
   0xb   : > { %p1338_p5 = por %p191_p2, %p190_p0  ;;  %p1342_p6 = por %p197_p4, %p196_p3 }
   0xc   : > { %p1020_p7 = scmp.ge.s32.totalorder %s1254_s29, 1  ;;  %p242_p8 = scmp.lt.s32.totalorder %s1254_s29, 3 }
   0xe   : > { %p243_p9 = pnand %p1020_p7, %p242_p8 }
   0xf   : > { %s1410_s24 = sshll.u32 (!%p243_p9), %s1016_s6, 2  ;;  %s803_s22 = sld [smem:[#allocation2]] (!%p243_p9) }
  0x10   : > { %246 = sbr.rel (%p243_p9) target bundleno = 544 (0x220), region = 48  ;;  %p275_p10 = scmp.lt.s32.totalorder (!%p243_p9), %s1410_s24, 7 }
  0x11   : > { %s271_s23 = sand.u32 (!%p243_p9), 1, %s1246_s27   ;;  %s953_s10 = scalar_lea.hbm (!%p243_p9), %s1570_s7, %s1410_s24 }
  0x12   : > { %s957_s15 = sshll.u32 (!%p243_p9), %s953_s10, 4  ;;  %s1212_s20 = scalar_lea.hbm (!%p243_p9), %s1570_s7, 8  ;;  %s958_s15 = int_to_ptr.hbm [resolvable:$true] %s957_s15 }
  0x13   : > { %s1206_s16 = sshra.s32 (!%p243_p9), %s958_s15, 4  ;;  %s1207_s16 = int_to_ptr.hbm [resolvable:$true] %s1206_s16 }
  0x14   : > { %s1208_s17 = scalar_lea.hbm (!%p243_p9), %s1207_s16, 4  ;;  %p1213_p0 = scmp.lt.s32.totalorder (!%p243_p9), %s1207_s16, %s1570_s7 }
  0x15   : > { %v285_v0 = vld [vmem:[%s1564_s1 + $0x10] sm:$0xff]  ;;  %v283_v1 = vld [vmem:[%s1564_s1] sm:$0xff]  ;;  %v1256_v2 = vmov 1   ;;  %v1257_v3 = vmov 0   ;;  %v286_v4 = vld [vmem:[%s1564_s1 + $0x18] sm:$0xff]  ;;  %s276_s25 = scalar_select %p275_p10, %s1410_s24, 7 }
  0x16   : > { %1117 = vset.pattern.permute.xlu0 %v1256_v2  ;;  %1115 = vset.pattern.permute.xlu1 %v1256_v2  ;;  %v284_v5 = vld [vmem:[%s1564_s1 + $0x8] sm:$0xff]  ;;  %v398_v6 = vld [vmem:[%s1565_s2 + $0x10] sm:$0xff]  ;;  %v396_v7 = vld [vmem:[%s1565_s2] sm:$0xff]  ;;  %vm482_vm0 = vcmask 261120   ;;  %vm930_vm15 = vcmask 1040384   ;;  %s943_s24 = scalar_lea.sflag [#allocation4], %s271_s23  ;;  %p1209_p11 = scmp.ne.s32.totalorder %s1207_s16, %s1208_s17 }
  0x17   : > { %1116 = vset.pattern.permute.xlu2 %v1257_v3  ;;  %345 = vperm.xlu1 %1115, %v285_v0   ;;  %v399_v8 = vld [vmem:[%s1565_s2 + $0x18] sm:$0xff]  ;;  %v397_v9 = vld [vmem:[%s1565_s2 + $0x8] sm:$0xff]  ;;  %v450_v11 = vld [vmem:[%s1567_s4 + $0x10] sm:$0xff]  ;;  %s1023_s30 = sshll.u32 %s276_s25, 1  ;;  %s1527_s25 = sshll.u32 %s271_s23, 2 }
  0x18   : > { %337 = vperm.xlu0 %1117, %v283_v1   ;;  %289 = vperm.xlu2 %1116, %v283_v1   ;;  %v451_v10 = vld [vmem:[%s1567_s4 + $0x18] sm:$0xff]  ;;  %v1044_v12 = vld [vmem:[%s1567_s4 + $0x20] sm:$0xff]  ;;  %v449_v13 = vld [vmem:[%s1567_s4 + $0x8] sm:$0xff]  ;;  %s278_s14 = scalar_lea.vmem %s1563_s0, %s1023_s30  ;;  %p1210_p12 = pnand %p1209_p11, %p1338_p5 }
  0x19   : > { %v448_v14 = vld [vmem:[%s1567_s4] sm:$0xff]  ;;  %v1047_v15 = vld [vmem:[%s1567_s4 + $0x38] sm:$0xff]  ;;  %v1046_v16 = vld [vmem:[%s1567_s4 + $0x30] sm:$0xff]  ;;  %p1214_p1 = scmp.lt.s32.totalorder %s1212_s20, %s1208_s17 }
  0x1a   : > { %v1045_v17 = vld [vmem:[%s1567_s4 + $0x28] sm:$0xff]  ;;  %v729_v18 = vld [vmem:[%s1568_s5 + $0x10] sm:$0xff]  ;;  %v727_v20 = vld [vmem:[%s1568_s5] sm:$0xff]  ;;  %p1211_p13 = pneg %p1210_p12 }
  0x1b   : > { %v728_v19 = vld [vmem:[%s1568_s5 + $0x8] sm:$0xff]  ;;  %v730_v21 = vld [vmem:[%s1568_s5 + $0x18] sm:$0xff]  ;;  %v1417_v25 = vld [vmem:[%s278_s14] sm:$0xff]  ;;  %s273_s14 = scalar_lea.vmem [#allocation3], %s1527_s25  ;;  %p1215_p2 = por %p1214_p1, %p1213_p0 }
  0x1c   : > { %v308_v26 = vperm.slane %v1417_v25, 0  ;;  %v309_v27 = vperm.slane %v1417_v25, 2  ;;  %v310_v28 = vperm.slane %v1417_v25, 4  ;;  %v311_v29 = vperm.slane %v1417_v25, 6  ;;  %s955_s6 = sshll.u32 %s273_s14, 4  ;;  %s956_s6 = int_to_ptr.vmem [resolvable:$true] %s955_s6 }
  0x1d   : > { %v352_v30 = vperm.slane %v1417_v25, 1  ;;  %v353_v31 = vperm.slane %v1417_v25, 3  ;;  %v354_v32 = vperm.slane %v1417_v25, 5  ;;  %v355_v33 = vperm.slane %v1417_v25, 7  ;;  %p1216_p3 = pnand %p1215_p2, %p1211_p13 }
  0x1e   : > { %v316_v35 = vperm.slane %v308_v26, 0  ;;  %v317_v36 = vperm.slane %v309_v27, 0  ;;  %v318_v38 = vperm.slane %v310_v28, 0  ;;  %v319_v39 = vperm.slane %v311_v29, 0 }
  0x1f   : > { %349 = vperm.xlu1 %1115, %v286_v4   ;;  %v360_v40 = vperm.slane %v352_v30, 1  ;;  %v361_v41 = vperm.slane %v353_v31, 1  ;;  %v362_v43 = vperm.slane %v354_v32, 1  ;;  %v363_v44 = vperm.slane %v355_v33, 1 }
  0x20   : > { %1118 = vset.pattern.permute.xlu0 %v1257_v3  ;;  %294 = vperm.xlu2 %1116, %v284_v5  }
  0x21   : > { %299 = vperm.xlu0 %1118, %v285_v0  }
  0x27   : > { %341 = vperm.xlu1 %1115, %v284_v5  }
  0x28   : > { %412 = vperm.xlu2 %1116, %v398_v6  }
  0x29   : > { %304 = vperm.xlu0 %1118, %v286_v4  }
  0x2f   : > { %1119 = vset.pattern.permute.xlu1 %v1257_v3 }
  0x30   : > { %402 = vperm.xlu2 %1116, %v396_v7   ;;  %417 = vperm.xlu1 %1119, %v399_v8  }
  0x31   : > { %407 = vperm.xlu0 %1118, %v397_v9  }
  0x38   : > { %469 = vperm.xlu2 %1116, %v451_v10   ;;  %464 = vperm.xlu1 %1119, %v450_v11  }
  0x39   : > { %601 = vperm.xlu0 %1118, %v1044_v12  }
  0x40   : > { %459 = vperm.xlu2 %1116, %v449_v13   ;;  %454 = vperm.xlu1 %1119, %v448_v14  }
  0x41   : > { %616 = vperm.xlu0 %1118, %v1047_v15  }
  0x48   : > { %611 = vperm.xlu2 %1116, %v1046_v16   ;;  %606 = vperm.xlu1 %1119, %v1045_v17  }
  0x49   : > { %743 = vperm.xlu0 %1118, %v729_v18  }
  0x50   : > { %738 = vperm.xlu2 %1116, %v728_v19   ;;  %733 = vperm.xlu1 %1119, %v727_v20  }
  0x58   : > { %748 = vperm.xlu1 %1119, %v730_v21  }
  0x72   : > { %v290_v22 = vpop.permute.xlu2 %289 }
  0x73   : > { %v320_v45 = vmul.f32 %v316_v35, %v290_v22  ;;  %v321_v46 = vmul.f32 %v317_v36, %v290_v22  ;;  %v322_v47 = vmul.f32 %v318_v38, %v290_v22  ;;  %v323_v48 = vmul.f32 %v319_v39, %v290_v22 }
  0x7a   : > { %v295_v37 = vpop.permute.xlu2 %294 }
  0x7b   : > { %v324_v55 = vmul.f32 %v316_v35, %v295_v37  ;;  %v325_v56 = vmul.f32 %v317_v36, %v295_v37  ;;  %v326_v57 = vmul.f32 %v318_v38, %v295_v37  ;;  %v327_v58 = vmul.f32 %v319_v39, %v295_v37 }
  0x82   : > { %v413_v5 = vpop.permute.xlu2 %412 }
  0x89   : > { %v346_v23 = vpop.permute.xlu1 %345 }
  0x8a   : > { %v338_v24 = vpop.permute.xlu0 %337  ;;  %v372_v60 = vmul.f32 %v360_v40, %v346_v23  ;;  %v373_v61 = vmul.f32 %v361_v41, %v346_v23  ;;  %v374_v0 = vmul.f32 %v362_v43, %v346_v23  ;;  %v375_v1 = vmul.f32 %v363_v44, %v346_v23 }
  0x8b   : > { %v364_v49 = vmul.f32 %v360_v40, %v338_v24  ;;  %v365_v50 = vmul.f32 %v361_v41, %v338_v24  ;;  %v366_v51 = vmul.f32 %v362_v43, %v338_v24  ;;  %v367_v52 = vmul.f32 %v363_v44, %v338_v24 }
  0x8d   : > { %v380_v3 = vadd.f32 %v364_v49, %v320_v45  ;;  %v381_v4 = vadd.f32 %v365_v50, %v321_v46  ;;  %v382_v8 = vadd.f32 %v366_v51, %v322_v47  ;;  %v383_v9 = vadd.f32 %v367_v52, %v323_v48  ;;  %v403_v49 = vpop.permute.xlu2 %402 }
  0x8f   : > { %v420_v52 = vadd.f32 %v403_v49, %v380_v3 }
  0x91   : > { %v350_v34 = vpop.permute.xlu1 %349 }
  0x92   : > { %v376_v18 = vmul.f32 %v360_v40, %v350_v34  ;;  %v377_v19 = vmul.f32 %v361_v41, %v350_v34  ;;  %v378_v20 = vmul.f32 %v362_v43, %v350_v34  ;;  %v379_v21 = vmul.f32 %v363_v44, %v350_v34 }
  0x93   : > { %v300_v42 = vpop.permute.xlu0 %299 }
  0x94   : > { %v328_v53 = vmul.f32 %v316_v35, %v300_v42  ;;  %v329_v54 = vmul.f32 %v317_v36, %v300_v42  ;;  %v330_v62 = vmul.f32 %v318_v38, %v300_v42  ;;  %v331_v63 = vmul.f32 %v319_v39, %v300_v42 }
  0x96   : > { %v388_v6 = vadd.f32 %v372_v60, %v328_v53  ;;  %v389_v7 = vadd.f32 %v373_v61, %v329_v54  ;;  %v390_v16 = vadd.f32 %v374_v0, %v330_v62  ;;  %v391_v17 = vadd.f32 %v375_v1, %v331_v63  ;;  %v1071_v61 = vld [vmem:[%s1566_s3 + $0x8] sm:$0xff] }
  0x97   : > { %v421_v53 = vadd.f32 %v403_v49, %v381_v4  ;;  %v422_v54 = vadd.f32 %v403_v49, %v382_v8 }
  0x98   : > { %v428_v24 = vadd.f32 %v413_v5, %v388_v6  ;;  %v429_v26 = vadd.f32 %v413_v5, %v389_v7  ;;  %v430_v32 = vadd.f32 %v413_v5, %v390_v16  ;;  %v431_v33 = vadd.f32 %v413_v5, %v391_v17  ;;  %v470_v5 = vpop.permute.xlu2 %469 }
  0x99   : > { %v342_v59 = vpop.permute.xlu1 %341 }
  0x9a   : > { %v368_v14 = vmul.f32 %v360_v40, %v342_v59  ;;  %v369_v15 = vmul.f32 %v361_v41, %v342_v59  ;;  %v370_v22 = vmul.f32 %v362_v43, %v342_v59  ;;  %v371_v23 = vmul.f32 %v363_v44, %v342_v59 }
  0x9b   : > { %v305_v2 = vpop.permute.xlu0 %304 }
  0x9c   : > { %v332_v10 = vmul.f32 %v316_v35, %v305_v2  ;;  %v333_v11 = vmul.f32 %v317_v36, %v305_v2  ;;  %v334_v12 = vmul.f32 %v318_v38, %v305_v2  ;;  %v335_v13 = vmul.f32 %v319_v39, %v305_v2 }
  0x9d   : > { %v384_v35 = vadd.f32 %v368_v14, %v324_v55  ;;  %v385_v36 = vadd.f32 %v369_v15, %v325_v56  ;;  %v386_v43 = vadd.f32 %v370_v22, %v326_v57  ;;  %v387_v44 = vadd.f32 %v371_v23, %v327_v58  ;;  %v1070_v58 = vld [vmem:[%s1566_s3] sm:$0xff] }
  0x9e   : > { %v392_v27 = vadd.f32 %v376_v18, %v332_v10  ;;  %v393_v28 = vadd.f32 %v377_v19, %v333_v11  ;;  %v394_v29 = vadd.f32 %v378_v20, %v334_v12  ;;  %v395_v30 = vadd.f32 %v379_v21, %v335_v13 }
  0x9f   : > { %v423_v55 = vadd.f32 %v403_v49, %v383_v9 }
  0xa0   : > { %v460_v19 = vpop.permute.xlu2 %459 }
  0xa2   : > { %v418_v31 = vpop.permute.xlu1 %417 }
  0xa3   : > { %v408_v37 = vpop.permute.xlu0 %407  ;;  %v432_v38 = vadd.f32 %v418_v31, %v392_v27  ;;  %v433_v39 = vadd.f32 %v418_v31, %v393_v28  ;;  %v434_v40 = vadd.f32 %v418_v31, %v394_v29  ;;  %v435_v41 = vadd.f32 %v418_v31, %v395_v30 }
  0xa4   : > { %v424_v42 = vadd.f32 %v408_v37, %v384_v35  ;;  %v425_v34 = vadd.f32 %v408_v37, %v385_v36  ;;  %v426_v50 = vadd.f32 %v408_v37, %v386_v43  ;;  %v427_v51 = vadd.f32 %v408_v37, %v387_v44 }
  0xa5   : > { %v444_v45 = vpack.c.bf16 %v432_v38, %v428_v24  ;;  %v445_v46 = vpack.c.bf16 %v433_v39, %v429_v26  ;;  %v446_v47 = vpack.c.bf16 %v434_v40, %v430_v32  ;;  %v447_v48 = vpack.c.bf16 %v435_v41, %v431_v33 }
  0xa6   : > { %v440_v56 = vpack.c.bf16 %v424_v42, %v420_v52  ;;  %v441_v59 = vpack.c.bf16 %v425_v34, %v421_v53  ;;  %v442_v60 = vpack.c.bf16 %v426_v50, %v422_v54  ;;  %v443_v57 = vpack.c.bf16 %v427_v51, %v423_v55  ;;  %v1072_v50 = vld [vmem:[%s1566_s3 + $0x10] sm:$0xff] }
  0xa7   : > { %495 = vmatpush.bf16.msra.mxu0 %v444_v45  ;;  %514 = vmatpush.bf16.msra.mxu1 %v445_v46 }
  0xa8   : > { %533 = vmatpush.bf16.msra.mxu2 %v446_v47  ;;  %552 = vmatpush.bf16.msra.mxu3 %v447_v48 }
  0xaa   : > { %v465_v4 = vpop.permute.xlu1 %464 }
  0xab   : > { %496 = vmatpush.bf16.msra.mxu0 %v440_v56  ;;  %515 = vmatpush.bf16.msra.mxu1 %v441_v59 }
  0xac   : > { %534 = vmatpush.bf16.msra.mxu2 %v442_v60  ;;  %553 = vmatpush.bf16.msra.mxu3 %v443_v57 }
  0xae   : > { %1032 = vmatmul.msk.bf16.vlgmr.msra.gmra.mxu0 %vm482_vm0, %v1070_v58  ;;  %1034 = vmatmul.msk.bf16.vlgmr.msra.gmra.mxu1 %vm482_vm0, %v1070_v58 }
  0xaf   : > { %1036 = vmatmul.msk.bf16.vlgmr.msra.gmra.mxu2 %vm482_vm0, %v1070_v58  ;;  %1038 = vmatmul.msk.bf16.vlgmr.msra.gmra.mxu3 %vm482_vm0, %v1070_v58  ;;  %v1073_v58 = vld [vmem:[%s1566_s3 + $0x18] sm:$0xff] }
  0xb2   : > { %v455_v10 = vpop.permute.xlu1 %454 }
  0xbe   : > { %1033 = vmatmul.msk.bf16.gmra.mxu0 %vm482_vm0, %v1071_v61  ;;  %1035 = vmatmul.msk.bf16.gmra.mxu1 %vm482_vm0, %v1071_v61 }
  0xbf   : > { %1037 = vmatmul.msk.bf16.gmra.mxu2 %vm482_vm0, %v1071_v61  ;;  %1039 = vmatmul.msk.bf16.gmra.mxu3 %vm482_vm0, %v1071_v61  ;;  %v809_v61 = vmul.f32 %v1417_v25, %v1417_v25 }
 0x12b   : > { %v498_v62 = vpop.f32.mrf.mxu0  ;;  %v517_v63 = vpop.f32.mrf.mxu1 }
 0x12c   : > { %v499_v11 = vadd.f32 %v498_v62, %v455_v10  ;;  %v518_v12 = vadd.f32 %v517_v63, %v455_v10  ;;  %v1064_v62 = vrot.slane %v809_v61, 9 }
 0x12e   : > { %1120 = vtanh.f32 %v499_v11  ;;  %v814_v63 = vadd.f32 %v1064_v62, %v809_v61 }
 0x12f   : > { %1122 = vtanh.f32 %v518_v12 }
 0x130   : > { %vm822_vm1 = vcmp.eq.f32.partialorder %v814_v63, inf  ;;  %vm824_vm2 = vcmp.eq.f32.partialorder %v814_v63, 0.0 }
 0x132   : > { %v536_v0 = vpop.f32.mrf.mxu2  ;;  %v555_v1 = vpop.f32.mrf.mxu3 }
 0x133   : > { %v500_v2 = vpop.f32.mrf.mxu0  ;;  %v519_v3 = vpop.f32.mrf.mxu1  ;;  %v537_v39 = vadd.f32 %v536_v0, %v455_v10  ;;  %v556_v41 = vadd.f32 %v555_v1, %v455_v10 }
 0x134   : > { %v501_v22 = vadd.f32 %v500_v2, %v460_v19  ;;  %v520_v23 = vadd.f32 %v519_v3, %v460_v19  ;;  %v1121_v27 = vpop.eup %1120 }
 0x135   : > { %v1123_v28 = vpop.eup %1122 }
 0x13a   : > { %v538_v6 = vpop.f32.mrf.mxu2  ;;  %v557_v7 = vpop.f32.mrf.mxu3 }
 0x13b   : > { %v503_v8 = vpop.f32.mrf.mxu0  ;;  %v522_v9 = vpop.f32.mrf.mxu1  ;;  %v539_v32 = vadd.f32 %v538_v6, %v460_v19  ;;  %v558_v37 = vadd.f32 %v557_v7, %v460_v19  ;;  %v825_v7 = vand.u32 2147483648, %v814_v63 }
 0x13c   : > { %v504_v13 = vadd.f32 %v503_v8, %v465_v4  ;;  %v523_v14 = vadd.f32 %v522_v9, %v465_v4 }
 0x13e   : > { %1124 = vtanh.f32 %v504_v13 }
 0x13f   : > { %1126 = vtanh.f32 %v523_v14 }
 0x142   : > { %v541_v15 = vpop.f32.mrf.mxu2  ;;  %v560_v16 = vpop.f32.mrf.mxu3 }
 0x143   : > { %v505_v17 = vpop.f32.mrf.mxu0  ;;  %v524_v18 = vpop.f32.mrf.mxu1  ;;  %v542_v24 = vadd.f32 %v541_v15, %v465_v4  ;;  %v561_v26 = vadd.f32 %v560_v16, %v465_v4 }
 0x144   : > { %v506_v20 = vadd.f32 %v505_v17, %v470_v5  ;;  %v525_v21 = vadd.f32 %v524_v18, %v470_v5  ;;  %v1125_v31 = vpop.eup %1124 }
 0x145   : > { %v1127_v36 = vpop.eup %1126 }
 0x146   : > { %1128 = vtanh.f32 %v506_v20 }
 0x147   : > { %1130 = vtanh.f32 %v525_v21 }
 0x148   : > { %1132 = vtanh.f32 %v501_v22 }
 0x149   : > { %1134 = vtanh.f32 %v520_v23 }
 0x14a   : > { %v543_v29 = vpop.f32.mrf.mxu2  ;;  %v562_v30 = vpop.f32.mrf.mxu3  ;;  %1136 = vtanh.f32 %v542_v24 }
 0x14b   : > { %v544_v33 = vadd.f32 %v543_v29, %v470_v5  ;;  %v563_v35 = vadd.f32 %v562_v30, %v470_v5  ;;  %1138 = vtanh.f32 %v561_v26 }
 0x14c   : > { %v1129_v38 = vpop.eup %1128 }
 0x14d   : > { %1140 = vtanh.f32 %v544_v33  ;;  %v1131_v40 = vpop.eup %1130  ;;  %v590_v42 = vpack.c.bf16 %v1129_v38, %v1125_v31 }
 0x14e   : > { %1142 = vtanh.f32 %v563_v35  ;;  %v1133_v34 = vpop.eup %1132  ;;  %v591_v43 = vpack.c.bf16 %v1131_v40, %v1127_v36 }
 0x14f   : > { %1144 = vtanh.f32 %v539_v32  ;;  %v1135_v44 = vpop.eup %1134  ;;  %641 = vmatpush.bf16.msrb.mxu0 %v590_v42  ;;  %v586_v47 = vpack.c.bf16 %v1133_v34, %v1121_v27  ;;  %v607_v42 = vpop.permute.xlu1 %606 }
 0x150   : > { %1146 = vtanh.f32 %v558_v37  ;;  %v1137_v45 = vpop.eup %1136  ;;  %660 = vmatpush.bf16.msrb.mxu1 %v591_v43  ;;  %v587_v49 = vpack.c.bf16 %v1135_v44, %v1123_v28  ;;  %v602_v37 = vpop.permute.xlu0 %601 }
 0x151   : > { %1148 = vtanh.f32 %v537_v39  ;;  %v1139_v46 = vpop.eup %1138 }
 0x152   : > { %1150 = vtanh.f32 %v556_v41 }
 0x153   : > { %v1141_v48 = vpop.eup %1140  ;;  %642 = vmatpush.bf16.msrb.mxu0 %v586_v47  ;;  %1152 = vrsqrt.f32 %v814_v63 }
 0x154   : > { %v1143_v51 = vpop.eup %1142  ;;  %v592_v52 = vpack.c.bf16 %v1141_v48, %v1137_v45  ;;  %661 = vmatpush.bf16.msrb.mxu1 %v587_v49  ;;  %v612_v49 = vpop.permute.xlu2 %611 }
 0x155   : > { %v1145_v53 = vpop.eup %1144  ;;  %v593_v54 = vpack.c.bf16 %v1143_v51, %v1139_v46 }
 0x156   : > { %v1147_v55 = vpop.eup %1146  ;;  %679 = vmatpush.bf16.msrb.mxu2 %v592_v52  ;;  %1056 = vmatmul.msk.bf16.vlgmr.msrb.gmra.mxu0 %vm482_vm0, %v1072_v50 }
 0x157   : > { %v1149_v56 = vpop.eup %1148  ;;  %698 = vmatpush.bf16.msrb.mxu3 %v593_v54  ;;  %1058 = vmatmul.msk.bf16.vlgmr.msrb.gmra.mxu1 %vm482_vm0, %v1072_v50 }
 0x158   : > { %v1151_v59 = vpop.eup %1150  ;;  %v588_v60 = vpack.c.bf16 %v1145_v53, %v1149_v56 }
 0x159   : > { %v589_v57 = vpack.c.bf16 %v1147_v55, %v1151_v59  ;;  %v1153_v0 = vpop.eup %1152  ;;  %v1474_v59 = vpop.permute.xlu0 %616 }
 0x15a   : > { %680 = vmatpush.bf16.msrb.mxu2 %v588_v60  ;;  %v816_v1 = vmul.f32 %v1153_v0, %v814_v63 }
 0x15b   : > { %699 = vmatpush.bf16.msrb.mxu3 %v589_v57 }
 0x15c   : > { %v817_v2 = vmul.f32 %v1153_v0, %v816_v1 }
 0x15d   : > { %1060 = vmatmul.msk.bf16.vlgmr.msrb.gmra.mxu2 %vm482_vm0, %v1072_v50 }
 0x15e   : > { %1062 = vmatmul.msk.bf16.vlgmr.msrb.gmra.mxu3 %vm482_vm0, %v1072_v50  ;;  %v818_v3 = vmul.f32 0.5, %v817_v2 }
 0x160   : > { %v819_v4 = vsub.f32 1.5, %v818_v3 }
 0x162   : > { %v820_v5 = vmul.f32 %v1153_v0, %v819_v4  ;;  %v1480_v0 = vpop.permute.xlu1 %733 }
 0x164   : > { %v821_v6 = vmul.f32 %v820_v5, %v814_v63 }
 0x166   : > { %1057 = vmatmul.msk.bf16.gmra.mxu0 %vm482_vm0, %v1073_v58  ;;  %v823_v8 = vsel %vm822_vm1, %v814_v63, %v821_v6  ;;  %vm934_vm1 = vcmask 1041408  }
 0x167   : > { %1059 = vmatmul.msk.bf16.gmra.mxu1 %vm482_vm0, %v1073_v58  ;;  %v1457_v9 = vsel %vm824_vm2, %v825_v7, %v823_v8 }
 0x168   : > { %v827_v10 = vmax.f32 %v1457_v9, 1e-12 }
 0x16a   : > { %1154 = vrcp.f32 %v827_v10  ;;  %v839_v15 = vand.u32 2147483648, %v827_v10  ;;  %vm833_vm3 = vweird.f32 %v827_v10  ;;  %v837_v17 = vand.u32 2147483647, %v827_v10 }
 0x16b   : > { %v844_v22 = vrot.slane %v827_v10, 7 }
 0x16c   : > { %v840_v18 = vor.u32 1.1754944e-38, %v839_v15  ;;  %vm838_vm6 = vcmp.eq.f32.partialorder %v837_v17, 8.507059e+37 }
 0x16d   : > { %1061 = vmatmul.msk.bf16.gmra.mxu2 %vm482_vm0, %v1073_v58  ;;  %1156 = vrcp.f32 %v844_v22  ;;  %vm851_vm7 = vweird.f32 %v844_v22  ;;  %v857_v45 = vand.u32 2147483648, %v844_v22  ;;  %v855_v48 = vand.u32 2147483647, %v844_v22 }
 0x16e   : > { %1063 = vmatmul.msk.bf16.gmra.mxu3 %vm482_vm0, %v1073_v58  ;;  %vm932_vm0 = vcmask 1042434  }
 0x16f   : > { %v858_v56 = vor.u32 1.1754944e-38, %v857_v45  ;;  %vm856_vm10 = vcmp.eq.f32.partialorder %v855_v48, 8.507059e+37 }
 0x170   : > { %v1155_v11 = vpop.eup %1154 }
 0x171   : > { %v829_v12 = vmul.f32 %v1155_v11, %v827_v10  ;;  %vm834_vm4 = vweird.f32 %v1155_v11 }
 0x172   : > { %vm835_vm5 = vmor %vm833_vm3, %vm834_vm4 }
 0x173   : > { %v830_v13 = vsub.f32 1.0, %v829_v12  ;;  %v1157_v28 = vpop.eup %1156 }
 0x174   : > { %v847_v32 = vmul.f32 %v1157_v28, %v844_v22  ;;  %vm852_vm8 = vweird.f32 %v1157_v28  ;;  %v1490_v22 = vpop.permute.xlu0 %743 }
 0x175   : > { %v831_v14 = vmul.f32 %v1155_v11, %v830_v13  ;;  %vm1470_vm9 = vmor %vm851_vm7, %vm852_vm8 }
 0x176   : > { %v848_v35 = vsub.f32 1.0, %v847_v32 }
 0x177   : > { %v832_v16 = vadd.f32 %v1155_v11, %v831_v14  ;;  %v1487_v14 = vpop.permute.xlu2 %738 }
 0x178   : > { %v849_v40 = vmul.f32 %v1157_v28, %v848_v35 }
 0x179   : > { %v836_v19 = vsel %vm835_vm5, %v1155_v11, %v832_v16 }
 0x17a   : > { %v841_v20 = vsel %vm838_vm6, %v840_v18, %v836_v19  ;;  %v850_v47 = vadd.f32 %v1157_v28, %v849_v40 }
 0x17b   : > { %v1461_v21 = vmul.f32 %v841_v20, %v1417_v25 }
 0x17c   : > { %v854_v60 = vsel %vm1470_vm9, %v1157_v28, %v850_v47 }
 0x17d   : > { %v861_v23 = vmul.f32 4.0, %v1461_v21  ;;  %v864_v27 = vmul.f32 3.0, %v1461_v21  ;;  %v859_v62 = vsel %vm856_vm10, %v858_v56, %v854_v60 }
 0x17e   : > { %v860_v8 = vmul.f32 %v859_v62, %v1417_v25 }
 0x17f   : > { %v862_v24 = vmul.f32 %v861_v23, %v1461_v21 }
 0x181   : > { %v863_v26 = vmul.f32 %v862_v24, %v1461_v21 }
 0x183   : > { %v865_v31 = vsub.f32 %v863_v26, %v864_v27  ;;  %v1065_v26 = vrot.slane %v860_v8, 9 }
 0x185   : > { %v866_v33 = vmul.f32 0.3, %v865_v31 }
 0x187   : > { %v1467_v39 = vadd.f32 1.0, %v866_v33 }
 0x189   : > { %1158 = vrcp.f32 %v1467_v39  ;;  %v879_v35 = vand.u32 2147483648, %v1467_v39  ;;  %vm873_vm11 = vweird.f32 %v1467_v39 }
 0x18b   : > { %v880_v56 = vor.u32 1.1754944e-38, %v879_v35 }
 0x18f   : > { %v1478_v57 = vpop.eup %1158 }
 0x190   : > { %v869_v1 = vmul.f32 %v1478_v57, %v1467_v39  ;;  %vm874_vm12 = vweird.f32 %v1478_v57 }
 0x191   : > { %vm1508_vm13 = vmor %vm873_vm11, %vm874_vm12 }
 0x192   : > { %v870_v16 = vsub.f32 1.0, %v869_v1 }
 0x194   : > { %v871_v32 = vmul.f32 %v1478_v57, %v870_v16 }
 0x196   : > { %v872_v47 = vadd.f32 %v1478_v57, %v871_v32 }
 0x1d3   : > { %v644_v29 = vpop.f32.mrf.mxu0 }
 0x1d4   : > { %v663_v30 = vpop.f32.mrf.mxu1  ;;  %v645_v34 = vadd.f32 %v644_v29, %v602_v37 }
 0x1d5   : > { %v664_v44 = vadd.f32 %v663_v30, %v602_v37 }
 0x1d6   : > { %1160 = vtanh.f32 %v645_v34 }
 0x1d7   : > { %1162 = vtanh.f32 %v664_v44 }
 0x1db   : > { %v646_v36 = vpop.f32.mrf.mxu0 }
 0x1dc   : > { %v665_v38 = vpop.f32.mrf.mxu1  ;;  %v647_v46 = vadd.f32 %v646_v36, %v607_v42  ;;  %v1161_v63 = vpop.eup %1160  ;;  %v884_v36 = vmul.f32 %v1467_v39, %v1461_v21  ;;  %v877_v21 = vand.u32 2147483647, %v1467_v39 }
 0x1dd   : > { %v666_v50 = vadd.f32 %v665_v38, %v607_v42  ;;  %v1163_v2 = vpop.eup %1162  ;;  %v751_v27 = vmul.f32 %v1161_v63, %v1480_v0  ;;  %v749_v38 = vpop.permute.xlu1 %748 }
 0x1de   : > { %1164 = vtanh.f32 %v647_v46  ;;  %v752_v30 = vmul.f32 %v1163_v2, %v1480_v0  ;;  %v891_v62 = vmul.f32 %v884_v36, %v884_v36  ;;  %vm878_vm14 = vcmp.eq.f32.partialorder %v877_v21, 8.507059e+37 }
 0x1df   : > { %1166 = vtanh.f32 %v666_v50 }
 0x1e0   : > { %v682_v41 = vpop.f32.mrf.mxu2 }
 0x1e1   : > { %v701_v43 = vpop.f32.mrf.mxu3  ;;  %v683_v5 = vadd.f32 %v682_v41, %v602_v37 }
 0x1e2   : > { %v702_v11 = vadd.f32 %v701_v43, %v602_v37  ;;  %v889_v43 = vmul.f32 %v1065_v26, %v1467_v39  ;;  %v876_v39 = vsel %vm1508_vm13, %v1478_v57, %v872_v47 }
 0x1e3   : > { %v649_v51 = vpop.f32.mrf.mxu0 }
 0x1e4   : > { %v650_v53 = vadd.f32 %v649_v51, %v612_v49  ;;  %v668_v54 = vpop.f32.mrf.mxu1  ;;  %v1165_v4 = vpop.eup %1164  ;;  %v892_v63 = vmul.f32 %v889_v43, %v889_v43 }
 0x1e5   : > { %v669_v55 = vadd.f32 %v668_v54, %v612_v49  ;;  %v1167_v10 = vpop.eup %1166  ;;  %v755_v18 = vmul.f32 %v1165_v4, %v1487_v14 }
 0x1e6   : > { %1168 = vtanh.f32 %v650_v53  ;;  %v756_v25 = vmul.f32 %v1167_v10, %v1487_v14  ;;  %v881_v10 = vsel %vm878_vm14, %v880_v56, %v876_v39  ;;  %v893_v57 = vsub.f32 %v891_v62, %v892_v63 }
 0x1e7   : > { %1170 = vtanh.f32 %v669_v55  ;;  %v767_v33 = vadd.f32 %v755_v18, %v751_v27 }
 0x1e8   : > { %v684_v58 = vpop.f32.mrf.mxu2  ;;  %v776_v40 = vadd.f32 %v756_v25, %v752_v30 }
 0x1e9   : > { %v703_v61 = vpop.f32.mrf.mxu3  ;;  %v685_v15 = vadd.f32 %v684_v58, %v607_v42 }
 0x1ea   : > { %v704_v19 = vadd.f32 %v703_v61, %v607_v42 }
 0x1eb   : > { %v651_v3 = vpop.f32.mrf.mxu0 }
 0x1ec   : > { %v652_v6 = vadd.f32 %v651_v3, %v1474_v59  ;;  %v670_v7 = vpop.f32.mrf.mxu1  ;;  %v1169_v13 = vpop.eup %1168 }
 0x1ed   : > { %v671_v12 = vadd.f32 %v670_v7, %v1474_v59  ;;  %v1171_v17 = vpop.eup %1170  ;;  %v759_v28 = vmul.f32 %v1169_v13, %v1490_v22 }
 0x1ee   : > { %1172 = vtanh.f32 %v652_v6  ;;  %v760_v31 = vmul.f32 %v1171_v17, %v1490_v22 }
 0x1ef   : > { %1174 = vtanh.f32 %v671_v12  ;;  %v768_v42 = vadd.f32 %v767_v33, %v759_v28 }
 0x1f0   : > { %v687_v20 = vpop.f32.mrf.mxu2  ;;  %1176 = vtanh.f32 %v683_v5  ;;  %v777_v45 = vadd.f32 %v776_v40, %v760_v31 }
 0x1f1   : > { %v688_v23 = vadd.f32 %v687_v20, %v612_v49  ;;  %v706_v24 = vpop.f32.mrf.mxu3  ;;  %1178 = vtanh.f32 %v702_v11 }
 0x1f2   : > { %v707_v29 = vadd.f32 %v706_v24, %v612_v49  ;;  %1180 = vtanh.f32 %v685_v15  ;;  %v890_v24 = vmul.f32 %v889_v43, %v884_v36 }
 0x1f3   : > { %1182 = vtanh.f32 %v704_v19 }
 0x1f4   : > { %v1173_v37 = vpop.eup %1172  ;;  %1184 = vtanh.f32 %v688_v23  ;;  %v882_v23 = vmul.f32 %v881_v10, %v1457_v9 }
 0x1f5   : > { %v1175_v41 = vpop.eup %1174  ;;  %v763_v34 = vmul.f32 %v1173_v37, %v749_v38  ;;  %1186 = vtanh.f32 %v707_v29 }
 0x1f6   : > { %v1177_v44 = vpop.eup %1176  ;;  %v764_v46 = vmul.f32 %v1175_v41, %v749_v38  ;;  %v883_v35 = vsub.f32 1.0, %v882_v23  ;;  %v804_v41 = vstv %s803_s22 }
 0x1f7   : > { %v1179_v48 = vpop.eup %1178  ;;  %v769_v49 = vadd.f32 %v768_v42, %v763_v34 }
 0x1f8   : > { %v689_v50 = vpop.f32.mrf.mxu2  ;;  %v1181_v52 = vpop.eup %1180  ;;  %v778_v53 = vadd.f32 %v777_v45, %v764_v46  ;;  %v754_v11 = vmul.f32 %v1179_v48, %v1480_v0  ;;  %v898_v43 = vperm.slane %v883_v35, 2  ;;  %v900_v56 = vperm.slane %v883_v35, 6 }
 0x1f9   : > { %v690_v54 = vadd.f32 %v689_v50, %v1474_v59  ;;  %v708_v55 = vpop.f32.mrf.mxu3  ;;  %v1183_v60 = vpop.eup %1182  ;;  %v770_v58 = vrot.slane %v769_v49, 4  ;;  %v757_v4 = vmul.f32 %v1181_v52, %v1487_v14  ;;  %v899_v52 = vperm.slane %v883_v35, 4 }
 0x1fa   : > { %v709_v61 = vadd.f32 %v708_v55, %v1474_v59  ;;  %v1185_v1 = vpop.eup %1184  ;;  %v779_v2 = vrot.slane %v778_v53, 4  ;;  %v758_v5 = vmul.f32 %v1183_v60, %v1487_v14  ;;  %v753_v59 = vmul.f32 %v1177_v44, %v1480_v0 }
 0x1fb   : > { %1188 = vtanh.f32 %v690_v54  ;;  %v1187_v3 = vpop.eup %1186  ;;  %v771_v6 = vadd.f32 %v770_v58, %v769_v49  ;;  %v761_v8 = vmul.f32 %v1185_v1, %v1490_v22  ;;  %v894_v0 = vmul.f32 0.5, %v893_v57 }
 0x1fc   : > { %1190 = vtanh.f32 %v709_v61  ;;  %v780_v7 = vadd.f32 %v779_v2, %v778_v53  ;;  %v762_v13 = vmul.f32 %v1187_v3, %v1490_v22  ;;  %v785_v15 = vadd.f32 %v757_v4, %v753_v59 }
 0x1fd   : > { %v794_v17 = vadd.f32 %v758_v5, %v754_v11  ;;  %v772_v18 = vrot.slane %v771_v6, 2  ;;  %v895_v37 = vadd.f32 %v894_v0, %v890_v24  ;;  %v897_v55 = vperm.slane %v883_v35, 0 }
 0x1fe   : > { %v781_v12 = vrot.slane %v780_v7, 2  ;;  %v786_v20 = vadd.f32 %v785_v15, %v761_v8  ;;  %v937_v5 = vlaneseq }
 0x1ff   : > { %v795_v27 = vadd.f32 %v794_v17, %v762_v13  ;;  %v773_v30 = vadd.f32 %v772_v18, %v771_v6 }
 0x200   : > { %v782_v19 = vadd.f32 %v781_v12, %v780_v7  ;;  %vm939_vm2 = vcmp.lt.s32.totalorder %v937_v5, 512 }
 0x201   : > { %v1189_v16 = vpop.eup %1188  ;;  %v774_v42 = vrot.slane %v773_v30, 1 }
 0x202   : > { %v1191_v14 = vpop.eup %1190  ;;  %v765_v25 = vmul.f32 %v1189_v16, %v749_v38  ;;  %v783_v26 = vrot.slane %v782_v19, 1 }
 0x203   : > { %v766_v28 = vmul.f32 %v1191_v14, %v749_v38  ;;  %v909_v38 = vmul.f32 %v895_v37, %v882_v23  ;;  %v775_v46 = vadd.f32 %v774_v42, %v773_v30 }
 0x204   : > { %v787_v29 = vadd.f32 %v786_v20, %v765_v25  ;;  %v784_v32 = vadd.f32 %v783_v26, %v782_v19 }
 0x205   : > { %v796_v22 = vadd.f32 %v795_v27, %v766_v28  ;;  %v912_v50 = vperm.slane %v909_v38, 2  ;;  %v805_v54 = vadd.f32 %v804_v41, %v775_v46  ;;  %v913_v58 = vperm.slane %v909_v38, 4 }
 0x206   : > { %v788_v31 = vrot.slane %v787_v29, 4  ;;  %v806_v36 = vadd.f32 %v804_v41, %v784_v32  ;;  %v914_v62 = vperm.slane %v909_v38, 6  ;;  %v911_v3 = vperm.slane %v909_v38, 0 }
 0x207   : > { %v797_v33 = vrot.slane %v796_v22, 4  ;;  %v905_v2 = vmul.f32 %v897_v55, %v805_v54 }
 0x208   : > { %v789_v40 = vadd.f32 %v788_v31, %v787_v29  ;;  %v906_v49 = vmul.f32 %v898_v43, %v806_v36 }
 0x209   : > { %v798_v34 = vadd.f32 %v797_v33, %v796_v22  ;;  %v919_v8 = vadd.f32 %v911_v3, %v905_v2 }
 0x20a   : > { %v790_v44 = vrot.slane %v789_v40, 2  ;;  %v920_v63 = vadd.f32 %v912_v50, %v906_v49 }
 0x20b   : > { %v799_v9 = vrot.slane %v798_v34, 2 }
 0x20c   : > { %v791_v45 = vadd.f32 %v790_v44, %v789_v40  ;;  %v927_v7 = vrot.slane %v920_v63, 7 }
 0x20d   : > { %v800_v47 = vadd.f32 %v799_v9, %v798_v34 }
 0x20e   : > { %v792_v21 = vrot.slane %v791_v45, 1  ;;  %v931_v11 = vsel %vm930_vm15, %v919_v8, %v927_v7 }
 0x20f   : > { %v801_v48 = vrot.slane %v800_v47, 1 }
 0x210   : > { %v793_v51 = vadd.f32 %v792_v21, %v791_v45 }
 0x211   : > { %v802_v53 = vadd.f32 %v801_v48, %v800_v47 }
 0x212   : > { %v807_v60 = vadd.f32 %v804_v41, %v793_v51 }
 0x213   : > { %v808_v61 = vadd.f32 %v804_v41, %v802_v53 }
 0x214   : > { %v907_v1 = vmul.f32 %v899_v52, %v807_v60 }
 0x215   : > { %v908_v39 = vmul.f32 %v900_v56, %v808_v61 }
 0x216   : > { %v921_v4 = vadd.f32 %v913_v58, %v907_v1 }
 0x217   : > { %v922_v6 = vadd.f32 %v914_v62, %v908_v39 }
 0x218   : > { %v928_v59 = vrot.slane %v921_v4, 6 }
 0x219   : > { %v929_v10 = vrot.slane %v922_v6, 5 }
 0x21b   : > { %v933_v12 = vsel %vm932_vm0, %v928_v59, %v929_v10 }
 0x21c   : > { %v935_v13 = vsel %vm934_vm1, %v931_v11, %v933_v12 }
 0x21d   : > { %941 = vst.msk [vmem:[%s273_s14] sm:$0xf] %vm939_vm2, %v935_v13 }
 0x21e   : > { %1219 = shalt.err (!%p1216_p3)
}
 0x21f   : > { %1074 = dma.vmem_to_hbm [thread:$0]  (%p1338_p5), %s956_s6, 64, %s958_s15, %s943_s24  }
 0x220 PF: > { %p1080_p4 = scmp.ge.s32.totalorder %s1254_s29, 2  ;;  %s969_s23 = sand.u32 1, %s1242_s26  }
 0x221   : > { %s970_s25 = scalar_lea.sflag [#allocation4], %s969_s23 }
 0x222   : > { %p1077_p7 = pnand %p1080_p4, %p1342_p6 }
 0x224   : > { %p1078_p8 = pneg %p1077_p7 }
 0x226   : > { %1237 = dma.done.wait (%p1078_p8), %s970_s25, 64  }
 0x227   : > { %1239 = vsyncadd (%p1078_p8), %s970_s25, 4294967232  ;;  %p18_p9 = scmp.ge.s32.totalorder %s1324_s8, 4   ;;  %s1577_s26 = smov %s1246_s27 }
 0x228   : > { %s1578_s27 = smov %s1250_s28  ;;  %s1579_s28 = smov %s1336_s11 }
 0x229   : > { %s1580_s29 = smov %s1324_s8  ;;  %20 = sbr.rel (!%p18_p9) target bundleno = 5 (0x5), region = 85 }
 0x22e   :  { %976 = vsyncpa [#allocation4], 1 }
 0x22f   :  { %978 = vsyncpa [#allocation4 + $0x1], 1 }

</bundles_post_ra>
